<compile_context>
chip_gen: v7x
topology: tpu7x:2x2x1
jax: 0.10.0
libtpu: 0.0.40
codegen_flags: <defaults>
</compile_context>

<pallas_src>
import functools

import jax
import jax.numpy as jnp
from jax.experimental import pallas as pl
from jax.experimental.pallas import tpu as pltpu


def _linear_kernel(x_ref, w_ref, b_ref, o_ref):
    # x_ref: (TM, F), w_ref: (F, C_pad), b_ref: (1, C_pad), o_ref: (TM, C_pad)
    acc = jnp.dot(x_ref[...], w_ref[...], preferred_element_type=jnp.float32)
    o_ref[...] = (acc + b_ref[...].astype(jnp.float32)).astype(o_ref.dtype)


def _round_up(n, m):
    return ((n + m - 1) // m) * m


@functools.partial(jax.jit, static_argnames=("tile_m", "min_pallas_rows"))
def amazon_head_forward(x, w, b, *, tile_m=2048, min_pallas_rows=512):
    """Forward pass of AmazonHead: y = x @ w.T + b.

    x: (B, 256)             (f32; bf16 also accepted as-is, f32 accumulate)
    w: (num_classes, 256)   (PyTorch nn.Linear layout)
    b: (num_classes,)
    returns: (B, num_classes) in x.dtype
    """
    B, F = x.shape
    C = w.shape[0]

    # Small-batch fast path: a 1-2 step grid cannot pipeline; the fixed pallas_call
    # overhead dominates and XLA's fused dot wins.  Force the kernel with
    # min_pallas_rows=0.
    if B < min_pallas_rows:
        return (jnp.dot(x, w.T.astype(x.dtype), preferred_element_type=jnp.float32)
                + b.astype(jnp.float32)).astype(x.dtype)

    # Lane-dense output: pad class dim up to a multiple of 128 (unmasked full vst).
    C_pad = _round_up(max(C, 128), 128)

    # Pad batch only to the 8-row sublane multiple; no-op when B % 8 == 0.
    B_pad = _round_up(B, 8)
    x_p = x if B_pad == B else jnp.pad(x, ((0, B_pad - B), (0, 0)))

    # Batch tile: multiple of 8 by construction; ragged last grid step is handled by
    # Pallas (out-of-range rows are masked on store, and each output row depends only
    # on its own input row, so undefined edge reads never pollute valid rows).
    TM = min(tile_m, B_pad)
    grid = pl.cdiv(B_pad, TM)

    # Tiny parameter transpose/pad, fused into this jit; weight matches x's dtype.
    w_t = jnp.pad(w.T, ((0, 0), (0, C_pad - C))).astype(x.dtype)   # (F, C_pad)
    b2 = jnp.pad(b, (0, C_pad - C)).reshape(1, C_pad)               # (1, C_pad)

    itemsize = x_p.dtype.itemsize
    cost = pl.CostEstimate(
        flops=2 * B_pad * F * C_pad,
        transcendentals=0,
        bytes_accessed=(B_pad * F * itemsize            # streamed x
                        + F * C_pad * itemsize          # resident weight
                        + C_pad * b2.dtype.itemsize     # resident bias
                        + B_pad * C_pad * itemsize),    # output
    )

    out = pl.pallas_call(
        _linear_kernel,
        out_shape=jax.ShapeDtypeStruct((B_pad, C_pad), x.dtype),
        grid_spec=pl.GridSpec(
            grid=(grid,),
            in_specs=[
                pl.BlockSpec((TM, F), lambda i: (i, 0)),      # streamed, double-buffered
                pl.BlockSpec((F, C_pad), lambda i: (0, 0)),   # VMEM-resident weight
                pl.BlockSpec((1, C_pad), lambda i: (0, 0)),   # VMEM-resident bias
            ],
            out_specs=pl.BlockSpec((TM, C_pad), lambda i: (i, 0)),
        ),
        compiler_params=pltpu.CompilerParams(
            dimension_semantics=("parallel",)),
        cost_estimate=cost,
    )(x_p, w_t, b2)

    # Trim at most 7 padded rows and the zero class columns (fuses under the jit).
    return out[:B, :C]


def amazon_head_reference(x, w, b):
    return x @ w.T + b


if __name__ == "__main__":
    num_classes = 10
    in_features = 256
    batch = 2

    key = jax.random.PRNGKey(0)
    kx, kw, kb, kx2 = jax.random.split(key, 4)

    # Deterministic synthetic params (PyTorch Linear shapes: W (10, 256), b (10,)).
    x = jax.random.normal(kx, (batch, in_features), dtype=jnp.float32)
    w = jax.random.normal(kw, (num_classes, in_features), dtype=jnp.float32) * 0.05
    b = jax.random.normal(kb, (num_classes,), dtype=jnp.float32) * 0.05

    # Small-shape test: force the Pallas kernel (bypass the small-batch fast path).
    out = amazon_head_forward(x, w, b, min_pallas_rows=0)
    out = jax.block_until_ready(out)
    ref = amazon_head_reference(x, w, b)
    assert out.shape == (batch, num_classes)
    assert jnp.allclose(out, ref, atol=1e-5, rtol=1e-5)

    # Larger batch: exercises a multi-step grid with a ragged last block
    # (1000 = 3*256 + 232) and the streamed/double-buffered x pipeline.
    x_big = jax.random.normal(kx2, (1000, in_features), dtype=jnp.float32)
    out_big = amazon_head_forward(x_big, w, b, tile_m=256)
    out_big = jax.block_until_ready(out_big)
    ref_big = amazon_head_reference(x_big, w, b)
    assert out_big.shape == (1000, num_classes)
    assert jnp.allclose(out_big, ref_big, atol=1e-3, rtol=1e-3)

    print("KERNEL_OK")
</pallas_src>

<mosaic_0001>
module attributes {stable_mosaic.version = 11 : i64} {
  func.func @_linear_kernel(%arg0: i32, %arg1: memref<8x256xf32, #tpu.memory_space<vmem>>, %arg2: memref<256x128xf32, #tpu.memory_space<vmem>>, %arg3: memref<1x128xf32, #tpu.memory_space<vmem>>, %arg4: memref<8x128xf32, #tpu.memory_space<vmem>>) attributes {dimension_semantics = [#tpu.dimension_semantics<parallel>], iteration_bounds = array<i64: 1>, scalar_prefetch = 0 : i64, scratch_operands = 0 : i64, tpu.core_type = #tpu.core_type<tc>, window_params = [{transform_indices = @transform_0, window_bounds = array<i64: 8, 256>}, {pipeline_mode = #tpu.pipeline_mode<synchronous>, transform_indices = @transform_1, window_bounds = array<i64: 256, 128>}, {pipeline_mode = #tpu.pipeline_mode<synchronous>, transform_indices = @transform_2, window_bounds = array<i64: 1, 128>}, {transform_indices = @transform_3, window_bounds = array<i64: 8, 128>}]} {
    %c0 = arith.constant 0 : index
    %c0_0 = arith.constant 0 : index
    %0 = vector.load %arg1[%c0, %c0_0] : memref<8x256xf32, #tpu.memory_space<vmem>>, vector<8x256xf32>
    %c0_1 = arith.constant 0 : index
    %c0_2 = arith.constant 0 : index
    %1 = vector.load %arg2[%c0_1, %c0_2] : memref<256x128xf32, #tpu.memory_space<vmem>>, vector<256x128xf32>
    %cst = arith.constant dense<0.000000e+00> : vector<8x128xf32>
    %2 = tpu.matmul %0, %1, %cst {dimension_numbers = #tpu.dot_dimension_numbers<[1], [0], [0], [1], [0, 0, 1, 1], [], []>} : vector<8x256xf32>, vector<256x128xf32>, vector<8x128xf32> -> vector<8x128xf32>
    %c0_3 = arith.constant 0 : index
    %c0_4 = arith.constant 0 : index
    %3 = vector.load %arg3[%c0_3, %c0_4] : memref<1x128xf32, #tpu.memory_space<vmem>>, vector<1x128xf32>
    %4 = vector.broadcast %3 : vector<1x128xf32> to vector<8x128xf32>
    %5 = arith.addf %2, %4 : vector<8x128xf32>
    %c0_5 = arith.constant 0 : index
    %c0_6 = arith.constant 0 : index
    %6 = vector.load %arg4[%c0_5, %c0_6] : memref<8x128xf32, #tpu.memory_space<vmem>>, vector<8x128xf32>
    tpu.vector_store %arg4[%c0_5, %c0_6], %5 {strides = array<i32>} : memref<8x128xf32, #tpu.memory_space<vmem>>, vector<8x128xf32>,
    return
  }
  func.func @transform_0(%arg0: i32) -> (i32, i32) {
    %c0_i32 = arith.constant 0 : i32
    %c0_i32_0 = arith.constant 0 : i32
    return %arg0, %c0_i32 : i32, i32
  }
  func.func @transform_1(%arg0: i32) -> (i32, i32) {
    %c0_i32 = arith.constant 0 : i32
    %c0_i32_0 = arith.constant 0 : i32
    %c0_i32_1 = arith.constant 0 : i32
    return %c0_i32, %c0_i32_0 : i32, i32
  }
  func.func @transform_2(%arg0: i32) -> (i32, i32) {
    %c0_i32 = arith.constant 0 : i32
    %c0_i32_0 = arith.constant 0 : i32
    %c0_i32_1 = arith.constant 0 : i32
    return %c0_i32, %c0_i32_0 : i32, i32
  }
  func.func @transform_3(%arg0: i32) -> (i32, i32) {
    %c0_i32 = arith.constant 0 : i32
    %c0_i32_0 = arith.constant 0 : i32
    return %arg0, %c0_i32 : i32, i32
  }
}

</mosaic_0001>

<bundles_post_ra>
// kernel: amazon_head_forward.1
= control target key start
LH: loop header
LB: loop body
LE: loop exit
PB: predicated region body
PF: predicated region fallthrough
CT: control target
= control target key end

     0   :  { %s326_s1 = inlined_call_operand.vmem [shape: f32[256,128], index: 1, kind: input, shape index: {}]   ;;  %s327_s0 = inlined_call_operand.vmem [shape: f32[8,256], index: 0, kind: input, shape index: {}]   ;;  %s328_s2 = inlined_call_operand.vmem [shape: f32[1,128], index: 2, kind: input, shape index: {}]   ;;  %s329_s3 = inlined_call_operand.vmem [shape: f32[8,128], index: 3, kind: output, shape index: {}]  }
   0x1   :  { %v32_v0 = vld [vmem:[%s326_s1 + $0x80] sm:$0xff]  ;;  %v33_v1 = vld [vmem:[%s326_s1 + $0x88] sm:$0xff]  ;;  %v34_v5 = vld [vmem:[%s326_s1 + $0x90] sm:$0xff] }
   0x2   :  { %v16_v2 = vld [vmem:[%s326_s1] sm:$0xff]  ;;  %v166_v3 = vpack.c.bf16 %v33_v1, %v32_v0  ;;  %v17_v4 = vld [vmem:[%s326_s1 + $0x8] sm:$0xff]  ;;  %v35_v6 = vld [vmem:[%s326_s1 + $0x98] sm:$0xff] }
   0x3   :  { %v168_v7 = vpack.c.bf16 %v17_v4, %v16_v2  ;;  %v170_v8 = vpack.c.bf16 %v35_v6, %v34_v5  ;;  %v18_v9 = vld [vmem:[%s326_s1 + $0x10] sm:$0xff]  ;;  %v19_v10 = vld [vmem:[%s326_s1 + $0x18] sm:$0xff]  ;;  %v36_v11 = vld [vmem:[%s326_s1 + $0xa0] sm:$0xff] }
   0x4   :  { %167 = vmatprep.subr.bf16.mxu0 %v166_v3  ;;  %v37_v12 = vld [vmem:[%s326_s1 + $0xa8] sm:$0xff]  ;;  %v172_v13 = vpack.c.bf16 %v19_v10, %v18_v9  ;;  %v20_v15 = vld [vmem:[%s326_s1 + $0x20] sm:$0xff]  ;;  %v38_v17 = vld [vmem:[%s326_s1 + $0xb0] sm:$0xff] }
   0x5   :  { %169 = vmatpush3.bf16.msra.mxu0 %v168_v7  ;;  %v174_v14 = vpack.c.bf16 %v37_v12, %v36_v11  ;;  %v21_v16 = vld [vmem:[%s326_s1 + $0x28] sm:$0xff]  ;;  %v39_v18 = vld [vmem:[%s326_s1 + $0xb8] sm:$0xff]  ;;  %v22_v21 = vld [vmem:[%s326_s1 + $0x30] sm:$0xff] }
   0x6   :  { %171 = vmatprep.subr.bf16.mxu0 %v170_v8  ;;  %v176_v19 = vpack.c.bf16 %v21_v16, %v20_v15  ;;  %v178_v20 = vpack.c.bf16 %v39_v18, %v38_v17  ;;  %v23_v22 = vld [vmem:[%s326_s1 + $0x38] sm:$0xff]  ;;  %v40_v23 = vld [vmem:[%s326_s1 + $0xc0] sm:$0xff]  ;;  %v41_v24 = vld [vmem:[%s326_s1 + $0xc8] sm:$0xff] }
   0x7   :  { %v15_v25 = vld [vmem:[%s327_s0 + $0x8] sm:$0xff]  ;;  %v180_v26 = vpack.c.bf16 %v23_v22, %v22_v21  ;;  %v182_v27 = vpack.c.bf16 %v41_v24, %v40_v23  ;;  %v24_v28 = vld [vmem:[%s326_s1 + $0x40] sm:$0xff]  ;;  %v42_v30 = vld [vmem:[%s326_s1 + $0xd0] sm:$0xff] }
   0x8   :  { %119 = vmatprep.mubr.f32.mxu0 %v15_v25  ;;  %v25_v29 = vld [vmem:[%s326_s1 + $0x48] sm:$0xff]  ;;  %v43_v31 = vld [vmem:[%s326_s1 + $0xd8] sm:$0xff]  ;;  %v26_v34 = vld [vmem:[%s326_s1 + $0x50] sm:$0xff] }
   0x9   :  { %173 = vmatpush3.bf16.msra.mxu0 %v172_v13  ;;  %v184_v32 = vpack.c.bf16 %v25_v29, %v24_v28  ;;  %v186_v33 = vpack.c.bf16 %v43_v31, %v42_v30  ;;  %v27_v35 = vld [vmem:[%s326_s1 + $0x58] sm:$0xff]  ;;  %v44_v36 = vld [vmem:[%s326_s1 + $0xe0] sm:$0xff]  ;;  %v45_v37 = vld [vmem:[%s326_s1 + $0xe8] sm:$0xff] }
   0xa   :  { %175 = vmatprep.subr.bf16.mxu0 %v174_v14  ;;  %v188_v38 = vpack.c.bf16 %v27_v35, %v26_v34  ;;  %v190_v39 = vpack.c.bf16 %v45_v37, %v44_v36  ;;  %v28_v40 = vld [vmem:[%s326_s1 + $0x60] sm:$0xff]  ;;  %v29_v41 = vld [vmem:[%s326_s1 + $0x68] sm:$0xff]  ;;  %v46_v42 = vld [vmem:[%s326_s1 + $0xf0] sm:$0xff] }
   0xb   :  { %v47_v43 = vld [vmem:[%s326_s1 + $0xf8] sm:$0xff]  ;;  %v192_v44 = vpack.c.bf16 %v29_v41, %v28_v40  ;;  %v30_v46 = vld [vmem:[%s326_s1 + $0x70] sm:$0xff]  ;;  %v14_v49 = vld [vmem:[%s327_s0] sm:$0xff] }
   0xc   :  { %v194_v45 = vpack.c.bf16 %v47_v43, %v46_v42  ;;  %v31_v47 = vld [vmem:[%s326_s1 + $0x78] sm:$0xff]  ;;  %v130_v51 = vld [vmem:[%s328_s2] ss:$0 sm:$0xff] }
   0xd   :  { %177 = vmatpush3.bf16.msra.mxu0 %v176_v19  ;;  %v196_v48 = vpack.c.bf16 %v31_v47, %v30_v46 }
   0xe   :  { %179 = vmatprep.subr.bf16.mxu0 %v178_v20 }
  0x11   :  { %181 = vmatpush3.bf16.msra.mxu0 %v180_v26 }
  0x12   :  { %183 = vmatprep.subr.bf16.mxu0 %v182_v27 }
  0x15   :  { %185 = vmatpush3.bf16.msra.mxu0 %v184_v32 }
  0x16   :  { %187 = vmatprep.subr.bf16.mxu0 %v186_v33 }
  0x19   :  { %189 = vmatpush3.bf16.msra.mxu0 %v188_v38 }
  0x1a   :  { %191 = vmatprep.subr.bf16.mxu0 %v190_v39 }
  0x1d   :  { %193 = vmatpush3.bf16.msra.mxu0 %v192_v44 }
  0x1e   :  { %195 = vmatprep.subr.bf16.mxu0 %v194_v45 }
  0x21   :  { %197 = vmatpush3.bf16.msra.mxu0 %v196_v48 }
  0x24   :  { %120 = vmatmul.mubr.f32.vlgmr.msra.gmra.mrb[0].mxu0 %v14_v49 }
  0xf7   :  { %v163_v50 = vpop.f32.mrb[0].mxu0 }
  0xf8   :  { %v164_v52 = vpop.f32.mrb[1].mxu0 }
  0xf9   :  { %v165_v53 = vadd.f32 %v164_v52, %v163_v50 }
  0xfb   :  { %v122_v54 = vadd.f32 %v165_v53, %v130_v51 }
  0xfd   :  { %125 = vst [vmem:[%s329_s3] sm:$0xff] %v122_v54 }

</bundles_post_ra>
